<compile_context>
chip_gen: v6e
topology: v6e:2x2x1
jax: 0.10.0
libtpu: 0.0.40
codegen_flags: <defaults>
</compile_context>

<pallas_src>
import jax
import jax.numpy as jnp
from jax.experimental import pallas as pl
from jax.experimental.pallas import tpu as pltpu

Z_DIM = 64
HIDDEN = 256
IMG_DIM = 1 * 28 * 28      # 784
SUBLANE = 16               # covers f32 (8) and bf16 (16) sublane packing


def _round_up(n, m):
    return ((n + m - 1) // m) * m


def generator_kernel(x_ref, w1_ref, b1_ref, w2_ref, b2_ref, o_ref):
    # Cast x to the matmul dtype in-kernel (cheap VPU cast, avoids a separate
    # wrapper-side XLA cast pass over x).
    x = x_ref[...].astype(w1_ref.dtype)
    # Linear 1: (tm, 64) @ (64, 256), f32 accumulation on the MXU.
    h = jnp.dot(x, w1_ref[...], preferred_element_type=jnp.float32)
    h = h + b1_ref[...]
    # LeakyReLU(0.1): single VPU max per vreg (valid for slope < 1).
    h = jnp.maximum(h, 0.1 * h)
    # Linear 2: (tm, 256) @ (256, 784), f32 accumulation on the MXU.
    y = jnp.dot(h.astype(w2_ref.dtype), w2_ref[...],
                preferred_element_type=jnp.float32)
    # Epilogue precision follows b2's dtype: f32 (default / v5e) or bf16
    # (v6e/v7x option).  Tanh runs on the EUP either way.
    y = y.astype(b2_ref.dtype) + b2_ref[...]
    o_ref[...] = jnp.tanh(y).astype(o_ref.dtype)


def prepare_params(w1, b1, w2, b2, *, use_bf16=True, bf16_epilogue=False):
    """One-time parameter prep (hoisted out of the per-call forward path)."""
    mm_dtype = jnp.bfloat16 if use_bf16 else jnp.float32
    ep_dtype = jnp.bfloat16 if bf16_epilogue else jnp.float32
    return (w1.astype(mm_dtype),
            b1.astype(jnp.float32),
            w2.astype(mm_dtype),
            b2.astype(ep_dtype))


def generator_forward(x, w1, b1, w2, b2, *, out_dtype=None, tm_cap=1024):
    """x: (B, 64); w1: (64, 256); b1: (1, 256); w2: (256, 784); b2: (1, 784).

    Params should already be prepared via `prepare_params` (no per-call
    casting/padding happens here).  Output is (B, 784) in `out_dtype`
    (default: x.dtype).
    """
    B, z = x.shape
    assert z == Z_DIM
    out_dtype = x.dtype if out_dtype is None else out_dtype

    # Balanced batch tiles:
    #   * >= 2 grid steps when the batch allows it (v7x megacore: both TCs),
    #   * <= tm_cap rows per tile (VMEM / scoped-limit headroom on all chips),
    #   * tm a multiple of the sublane packing; the last partial block is
    #     masked on writeback, so no batch padding and no post-kernel slice.
    n_tiles = max(pl.cdiv(B, tm_cap), 2 if B >= 2 * SUBLANE else 1)
    tm = _round_up(pl.cdiv(B, n_tiles), SUBLANE)
    if tm >= B:
        tm = B  # single block covering the whole (possibly unaligned) batch
    grid = (pl.cdiv(B, tm),)

    return pl.pallas_call(
        generator_kernel,
        out_shape=jax.ShapeDtypeStruct((B, IMG_DIM), out_dtype),
        grid_spec=pltpu.PrefetchScalarGridSpec(
            num_scalar_prefetch=0,
            grid=grid,
            in_specs=[
                pl.BlockSpec((tm, Z_DIM), lambda i: (i, 0)),        # x tile
                pl.BlockSpec((Z_DIM, HIDDEN), lambda i: (0, 0)),    # W1 (resident)
                pl.BlockSpec((1, HIDDEN), lambda i: (0, 0)),        # b1
                pl.BlockSpec((HIDDEN, IMG_DIM), lambda i: (0, 0)),  # W2 (resident)
                pl.BlockSpec((1, IMG_DIM), lambda i: (0, 0)),       # b2
            ],
            out_specs=pl.BlockSpec((tm, IMG_DIM), lambda i: (i, 0)),
        ),
        compiler_params=pltpu.CompilerParams(
            dimension_semantics=("parallel",)),
    )(x, w1, b1, w2, b2)


def init_params(key):
    # Deterministic init mimicking torch.nn.Linear default:
    # U(-1/sqrt(fan_in), 1/sqrt(fan_in)) for both weight and bias.
    k1, k2, k3, k4 = jax.random.split(key, 4)
    lim1 = 1.0 / (Z_DIM ** 0.5)
    lim2 = 1.0 / (HIDDEN ** 0.5)
    w1 = jax.random.uniform(k1, (Z_DIM, HIDDEN), jnp.float32, -lim1, lim1)
    b1 = jax.random.uniform(k2, (1, HIDDEN), jnp.float32, -lim1, lim1)
    w2 = jax.random.uniform(k3, (HIDDEN, IMG_DIM), jnp.float32, -lim2, lim2)
    b2 = jax.random.uniform(k4, (1, IMG_DIM), jnp.float32, -lim2, lim2)
    return w1, b1, w2, b2


def reference_forward(x, w1, b1, w2, b2):
    h = x @ w1 + b1
    h = jnp.where(h > 0, h, 0.1 * h)
    return jnp.tanh(h @ w2 + b2)


if __name__ == "__main__":
    key = jax.random.PRNGKey(0)
    kx1, kx2, kp = jax.random.split(key, 3)
    w1, b1, w2, b2 = init_params(kp)

    # --- exact f32 path: tiny batch, single (unaligned) block, f32 store ---
    B1 = 12
    x1 = jax.random.normal(kx1, (B1, Z_DIM), jnp.float32)
    ref1 = reference_forward(x1, w1, b1, w2, b2)
    p_f32 = prepare_params(w1, b1, w2, b2, use_bf16=False, bf16_epilogue=False)
    out1 = jax.block_until_ready(generator_forward(x1, *p_f32))
    assert out1.shape == (B1, IMG_DIM) and out1.dtype == jnp.float32
    assert jnp.allclose(out1, ref1, atol=1e-5, rtol=1e-5)

    # --- fast path: bf16 MXU operands, bf16 epilogue, bf16 output store,
    #     multi-step grid with a masked partial last block ---
    B2 = 40
    x2 = jax.random.normal(kx2, (B2, Z_DIM), jnp.float32)
    ref2 = reference_forward(x2, w1, b1, w2, b2)
    p_bf16 = prepare_params(w1, b1, w2, b2, use_bf16=True, bf16_epilogue=True)
    out2 = jax.block_until_ready(
        generator_forward(x2, *p_bf16, out_dtype=jnp.bfloat16))
    assert out2.shape == (B2, IMG_DIM) and out2.dtype == jnp.bfloat16
    assert jnp.allclose(out2.astype(jnp.float32), ref2, atol=5e-2, rtol=5e-2)

    print("KERNEL_OK")
</pallas_src>

<mosaic_0001>
module attributes {stable_mosaic.version = 11 : i64} {
  func.func @generator_kernel(%arg0: i32, %arg1: memref<12x64xf32, #tpu.memory_space<vmem>>, %arg2: memref<64x256xf32, #tpu.memory_space<vmem>>, %arg3: memref<1x256xf32, #tpu.memory_space<vmem>>, %arg4: memref<256x784xf32, #tpu.memory_space<vmem>>, %arg5: memref<1x784xf32, #tpu.memory_space<vmem>>, %arg6: memref<12x784xf32, #tpu.memory_space<vmem>>) attributes {dimension_semantics = [#tpu.dimension_semantics<parallel>], iteration_bounds = array<i64: 1>, scalar_prefetch = 0 : i64, scratch_operands = 0 : i64, tpu.core_type = #tpu.core_type<tc>, window_params = [{transform_indices = @transform_0, window_bounds = array<i64: 12, 64>}, {pipeline_mode = #tpu.pipeline_mode<synchronous>, transform_indices = @transform_1, window_bounds = array<i64: 64, 256>}, {pipeline_mode = #tpu.pipeline_mode<synchronous>, transform_indices = @transform_2, window_bounds = array<i64: 1, 256>}, {pipeline_mode = #tpu.pipeline_mode<synchronous>, transform_indices = @transform_3, window_bounds = array<i64: 256, 784>}, {pipeline_mode = #tpu.pipeline_mode<synchronous>, transform_indices = @transform_4, window_bounds = array<i64: 1, 784>}, {transform_indices = @transform_5, window_bounds = array<i64: 12, 784>}]} {
    %c0 = arith.constant 0 : index
    %c0_0 = arith.constant 0 : index
    %0 = vector.load %arg1[%c0, %c0_0] : memref<12x64xf32, #tpu.memory_space<vmem>>, vector<12x64xf32>
    %c0_1 = arith.constant 0 : index
    %c0_2 = arith.constant 0 : index
    %1 = vector.load %arg2[%c0_1, %c0_2] : memref<64x256xf32, #tpu.memory_space<vmem>>, vector<64x256xf32>
    %cst = arith.constant dense<0.000000e+00> : vector<12x256xf32>
    %2 = tpu.matmul %0, %1, %cst {dimension_numbers = #tpu.dot_dimension_numbers<[1], [0], [0], [1], [0, 0, 1, 1], [], []>} : vector<12x64xf32>, vector<64x256xf32>, vector<12x256xf32> -> vector<12x256xf32>
    %c0_3 = arith.constant 0 : index
    %c0_4 = arith.constant 0 : index
    %3 = vector.load %arg3[%c0_3, %c0_4] : memref<1x256xf32, #tpu.memory_space<vmem>>, vector<1x256xf32>
    %4 = vector.broadcast %3 : vector<1x256xf32> to vector<12x256xf32>
    %5 = arith.addf %2, %4 : vector<12x256xf32>
    %cst_5 = arith.constant 1.000000e-01 : f32
    %6 = vector.broadcast %cst_5 : f32 to vector<12x256xf32>
    %7 = arith.mulf %6, %5 : vector<12x256xf32>
    %8 = arith.maximumf %5, %7 : vector<12x256xf32>
    %c0_6 = arith.constant 0 : index
    %c0_7 = arith.constant 0 : index
    %9 = vector.load %arg4[%c0_6, %c0_7] : memref<256x784xf32, #tpu.memory_space<vmem>>, vector<256x784xf32>
    %cst_8 = arith.constant dense<0.000000e+00> : vector<12x784xf32>
    %10 = tpu.matmul %8, %9, %cst_8 {dimension_numbers = #tpu.dot_dimension_numbers<[1], [0], [0], [1], [0, 0, 1, 1], [], []>} : vector<12x256xf32>, vector<256x784xf32>, vector<12x784xf32> -> vector<12x784xf32>
    %c0_9 = arith.constant 0 : index
    %c0_10 = arith.constant 0 : index
    %11 = vector.load %arg5[%c0_9, %c0_10] : memref<1x784xf32, #tpu.memory_space<vmem>>, vector<1x784xf32>
    %12 = vector.broadcast %11 : vector<1x784xf32> to vector<12x784xf32>
    %13 = arith.addf %10, %12 : vector<12x784xf32>
    %14 = math.tanh %13 : vector<12x784xf32>
    %c0_11 = arith.constant 0 : index
    %c0_12 = arith.constant 0 : index
    %15 = vector.load %arg6[%c0_11, %c0_12] : memref<12x784xf32, #tpu.memory_space<vmem>>, vector<12x784xf32>
    tpu.vector_store %arg6[%c0_11, %c0_12], %14 {strides = array<i32>} : memref<12x784xf32, #tpu.memory_space<vmem>>, vector<12x784xf32>,
    return
  }
  func.func @transform_0(%arg0: i32) -> (i32, i32) {
    %c0_i32 = arith.constant 0 : i32
    %c0_i32_0 = arith.constant 0 : i32
    return %arg0, %c0_i32 : i32, i32
  }
  func.func @transform_1(%arg0: i32) -> (i32, i32) {
    %c0_i32 = arith.constant 0 : i32
    %c0_i32_0 = arith.constant 0 : i32
    %c0_i32_1 = arith.constant 0 : i32
    return %c0_i32, %c0_i32_0 : i32, i32
  }
  func.func @transform_2(%arg0: i32) -> (i32, i32) {
    %c0_i32 = arith.constant 0 : i32
    %c0_i32_0 = arith.constant 0 : i32
    %c0_i32_1 = arith.constant 0 : i32
    return %c0_i32, %c0_i32_0 : i32, i32
  }
  func.func @transform_3(%arg0: i32) -> (i32, i32) {
    %c0_i32 = arith.constant 0 : i32
    %c0_i32_0 = arith.constant 0 : i32
    %c0_i32_1 = arith.constant 0 : i32
    return %c0_i32, %c0_i32_0 : i32, i32
  }
  func.func @transform_4(%arg0: i32) -> (i32, i32) {
    %c0_i32 = arith.constant 0 : i32
    %c0_i32_0 = arith.constant 0 : i32
    %c0_i32_1 = arith.constant 0 : i32
    return %c0_i32, %c0_i32_0 : i32, i32
  }
  func.func @transform_5(%arg0: i32) -> (i32, i32) {
    %c0_i32 = arith.constant 0 : i32
    %c0_i32_0 = arith.constant 0 : i32
    return %arg0, %c0_i32 : i32, i32
  }
}

</mosaic_0001>

<bundles_post_ra>
// kernel: tpu_custom_call.1
= control target key start
LH: loop header
LB: loop body
LE: loop exit
PB: predicated region body
PF: predicated region fallthrough
CT: control target
= control target key end

     0   :  { %v850_v4 = vmov 0.0   ;;  %vm51_vm0 = vcmask 523264   ;;  %s1665_s0 = inlined_call_operand.vmem [shape: f32[12,64], index: 0, kind: input, shape index: {}]   ;;  %s1666_s1 = inlined_call_operand.vmem [shape: f32[64,256], index: 1, kind: input, shape index: {}]   ;;  %s1667_s2 = inlined_call_operand.vmem [shape: f32[1,256], index: 2, kind: input, shape index: {}]   ;;  %s1668_s3 = inlined_call_operand.vmem [shape: f32[256,784], index: 3, kind: input, shape index: {}]   ;;  %s1669_s4 = inlined_call_operand.vmem [shape: f32[1,784], index: 4, kind: input, shape index: {}]   ;;  %s1670_s5 = inlined_call_operand.hbm [shape: f32[12,784], index: 5, kind: output, shape index: {}]  }
   0x1   :  { %v38_v0 = vld [vmem:[%s1666_s1 + $0x78] sm:$0xff]  ;;  %v37_v1 = vld [vmem:[%s1666_s1 + $0x70] sm:$0xff]  ;;  %v36_v2 = vld [vmem:[%s1666_s1 + $0x68] sm:$0xff]  ;;  %122 = vmatprep.mubr.f32.mxu0 %v850_v4 }
   0x2   :  { %74 = vmatprep.subr.mxu0 %v38_v0  ;;  %v35_v3 = vld [vmem:[%s1666_s1 + $0x60] sm:$0xff]  ;;  %v34_v5 = vld [vmem:[%s1666_s1 + $0x58] sm:$0xff]  ;;  %v33_v6 = vld [vmem:[%s1666_s1 + $0x50] sm:$0xff] }
   0x3   :  { %75 = vmatpush1.msra.mxu0 %v37_v1  ;;  %v32_v7 = vld [vmem:[%s1666_s1 + $0x48] sm:$0xff]  ;;  %v31_v8 = vld [vmem:[%s1666_s1 + $0x40] sm:$0xff]  ;;  %v30_v9 = vld [vmem:[%s1666_s1 + $0x38] sm:$0xff] }
   0x4   :  { %76 = vmatprep.subr.mxu0 %v36_v2  ;;  %v249_v10 = vld [vmem:[%s1668_s3 + $0x350] sm:$0xff]  ;;  %v248_v11 = vld [vmem:[%s1668_s3 + $0x348] sm:$0xff]  ;;  %v242_v13 = vld [vmem:[%s1668_s3 + $0x318] sm:$0xff] }
   0x5   :  { %77 = vmatpush1.msra.mxu0 %v35_v3  ;;  %v29_v12 = vld [vmem:[%s1666_s1 + $0x30] sm:$0xff]  ;;  %404 = vmatprep.subr.mxu1 %v249_v10  ;;  %v28_v14 = vld [vmem:[%s1666_s1 + $0x28] sm:$0xff]  ;;  %v235_v16 = vld [vmem:[%s1668_s3 + $0x2e0] sm:$0xff] }
   0x6   :  { %78 = vmatprep.subr.mxu0 %v34_v5  ;;  %405 = vmatpush1.msra.mxu1 %v248_v11  ;;  %v241_v15 = vld [vmem:[%s1668_s3 + $0x310] sm:$0xff]  ;;  %v27_v17 = vld [vmem:[%s1666_s1 + $0x20] sm:$0xff]  ;;  %v234_v18 = vld [vmem:[%s1668_s3 + $0x2d8] sm:$0xff] }
   0x7   :  { %79 = vmatpush1.msra.mxu0 %v33_v6  ;;  %406 = vmatprep.subr.mxu1 %v242_v13  ;;  %v26_v19 = vld [vmem:[%s1666_s1 + $0x18] sm:$0xff]  ;;  %v228_v20 = vld [vmem:[%s1668_s3 + $0x2a8] sm:$0xff]  ;;  %v25_v21 = vld [vmem:[%s1666_s1 + $0x10] sm:$0xff] }
   0x8   :  { %80 = vmatprep.subr.mxu0 %v32_v7  ;;  %407 = vmatpush1.msra.mxu1 %v241_v15  ;;  %v227_v22 = vld [vmem:[%s1668_s3 + $0x2a0] sm:$0xff]  ;;  %v24_v23 = vld [vmem:[%s1666_s1 + $0x8] sm:$0xff]  ;;  %v221_v24 = vld [vmem:[%s1668_s3 + $0x270] sm:$0xff] }
   0x9   :  { %81 = vmatpush1.msra.mxu0 %v31_v8  ;;  %408 = vmatprep.subr.mxu1 %v235_v16  ;;  %v23_v25 = vld [vmem:[%s1666_s1] sm:$0xff]  ;;  %v220_v26 = vld [vmem:[%s1668_s3 + $0x268] sm:$0xff]  ;;  %v250_v29 = vld [vmem:[%s1668_s3 + $0x358] sm:$0xff] }
   0xa   :  { %82 = vmatprep.subr.mxu0 %v30_v9  ;;  %409 = vmatpush1.msra.mxu1 %v234_v18  ;;  %v21_v27 = vld [vmem:[%s1665_s0] sm:$0xff]  ;;  %v244_v30 = vld [vmem:[%s1668_s3 + $0x328] sm:$0xff]  ;;  %v214_v31 = vld [vmem:[%s1668_s3 + $0x238] sm:$0xff] }
   0xb   :  { %83 = vmatpush1.msra.mxu0 %v29_v12  ;;  %410 = vmatprep.subr.mxu1 %v228_v20  ;;  %v251_v28 = vld [vmem:[%s1668_s3 + $0x360] sm:$0xff]  ;;  %v213_v33 = vld [vmem:[%s1668_s3 + $0x230] sm:$0xff]  ;;  %v22_v34 = vld [vmem:[%s1665_s0 + $0x8] sm:$0xf] }
   0xc   :  { %84 = vmatprep.subr.mxu0 %v28_v14  ;;  %411 = vmatpush1.msra.mxu1 %v227_v22  ;;  %v243_v32 = vld [vmem:[%s1668_s3 + $0x320] sm:$0xff]  ;;  %v237_v35 = vld [vmem:[%s1668_s3 + $0x2f0] sm:$0xff]  ;;  %v236_v36 = vld [vmem:[%s1668_s3 + $0x2e8] sm:$0xff] }
   0xd   :  { %85 = vmatpush1.msra.mxu0 %v27_v17  ;;  %412 = vmatprep.subr.mxu1 %v221_v24  ;;  %v207_v37 = vld [vmem:[%s1668_s3 + $0x200] sm:$0xff]  ;;  %v230_v38 = vld [vmem:[%s1668_s3 + $0x2b8] sm:$0xff]  ;;  %v229_v40 = vld [vmem:[%s1668_s3 + $0x2b0] sm:$0xff] }
   0xe   :  { %86 = vmatprep.subr.mxu0 %v26_v19  ;;  %413 = vmatpush1.msra.mxu1 %v220_v26  ;;  %v206_v39 = vld [vmem:[%s1668_s3 + $0x1f8] sm:$0xff]  ;;  %v200_v41 = vld [vmem:[%s1668_s3 + $0x1c8] sm:$0xff]  ;;  %v223_v42 = vld [vmem:[%s1668_s3 + $0x280] sm:$0xff] }
   0xf   :  { %87 = vmatpush1.msra.mxu0 %v25_v21  ;;  %414 = vmatprep.subr.mxu1 %v214_v31  ;;  %v199_v43 = vld [vmem:[%s1668_s3 + $0x1c0] sm:$0xff]  ;;  %v222_v44 = vld [vmem:[%s1668_s3 + $0x278] sm:$0xff]  ;;  %v193_v45 = vld [vmem:[%s1668_s3 + $0x190] sm:$0xff] }
  0x10   :  { %88 = vmatprep.subr.mxu0 %v24_v23  ;;  %415 = vmatpush1.msra.mxu1 %v213_v33  ;;  %v216_v46 = vld [vmem:[%s1668_s3 + $0x248] sm:$0xff]  ;;  %v215_v48 = vld [vmem:[%s1668_s3 + $0x240] sm:$0xff]  ;;  %v186_v49 = vld [vmem:[%s1668_s3 + $0x158] sm:$0xff] }
  0x11   :  { %89 = vmatpush1.msra.mxu0 %v23_v25  ;;  %416 = vmatprep.subr.mxu1 %v207_v37  ;;  %v192_v47 = vld [vmem:[%s1668_s3 + $0x188] sm:$0xff]  ;;  %v209_v50 = vld [vmem:[%s1668_s3 + $0x210] sm:$0xff]  ;;  %v179_v53 = vld [vmem:[%s1668_s3 + $0x120] sm:$0xff] }
  0x12   :  { %756 = vmatmul.mubr.msk.f32.vlgmr.msra.gmra.mxu0 %vm51_vm0, %v21_v27  ;;  %481 = vmatprep.subr.mxu0 %v251_v28  ;;  %v185_v51 = vld [vmem:[%s1668_s3 + $0x150] sm:$0xff]  ;;  %v208_v52 = vld [vmem:[%s1668_s3 + $0x208] sm:$0xff]  ;;  %v202_v54 = vld [vmem:[%s1668_s3 + $0x1d8] sm:$0xff] }
  0x13   :  { %128 = vmatprep.mubr.f32.mxu0 %v850_v4  ;;  %482 = vmatpush1.msra.mxu0 %v250_v29  ;;  %v178_v55 = vld [vmem:[%s1668_s3 + $0x118] sm:$0xff]  ;;  %v201_v56 = vld [vmem:[%s1668_s3 + $0x1d0] sm:$0xff]  ;;  %v172_v57 = vld [vmem:[%s1668_s3 + $0xe8] sm:$0xff] }
  0x14   :  { %483 = vmatprep.subr.mxu0 %v244_v30  ;;  %417 = vmatpush1.msra.mxu1 %v206_v39  ;;  %v195_v58 = vld [vmem:[%s1668_s3 + $0x1a0] sm:$0xff]  ;;  %v194_v60 = vld [vmem:[%s1668_s3 + $0x198] sm:$0xff]  ;;  %v165_v61 = vld [vmem:[%s1668_s3 + $0xb0] sm:$0xff] }
  0x15   :  { %484 = vmatpush1.msra.mxu0 %v243_v32  ;;  %418 = vmatprep.subr.mxu1 %v200_v41  ;;  %v171_v59 = vld [vmem:[%s1668_s3 + $0xe0] sm:$0xff]  ;;  %v188_v62 = vld [vmem:[%s1668_s3 + $0x168] sm:$0xff]  ;;  %v158_v1 = vld [vmem:[%s1668_s3 + $0x78] sm:$0xff] }
  0x16   :  { %757 = vmatmul.mubr.msk.f32.gmra.mxu0 %vm51_vm0, %v22_v34  ;;  %485 = vmatprep.subr.mxu0 %v237_v35  ;;  %v164_v63 = vld [vmem:[%s1668_s3 + $0xa8] sm:$0xff]  ;;  %v187_v0 = vld [vmem:[%s1668_s3 + $0x160] sm:$0xff]  ;;  %v181_v2 = vld [vmem:[%s1668_s3 + $0x130] sm:$0xff] }
  0x17   :  { %486 = vmatpush1.msra.mxu0 %v236_v36  ;;  %419 = vmatpush1.msra.mxu1 %v199_v43  ;;  %v157_v3 = vld [vmem:[%s1668_s3 + $0x70] sm:$0xff]  ;;  %v180_v4 = vld [vmem:[%s1668_s3 + $0x128] sm:$0xff]  ;;  %v151_v5 = vld [vmem:[%s1668_s3 + $0x40] sm:$0xff] }
  0x18   :  { %487 = vmatprep.subr.mxu0 %v230_v38  ;;  %420 = vmatprep.subr.mxu1 %v193_v45  ;;  %v174_v6 = vld [vmem:[%s1668_s3 + $0xf8] sm:$0xff]  ;;  %v173_v8 = vld [vmem:[%s1668_s3 + $0xf0] sm:$0xff]  ;;  %v144_v9 = vld [vmem:[%s1668_s3 + $0x8] sm:$0xff] }
  0x19   :  { %488 = vmatpush1.msra.mxu0 %v229_v40  ;;  %421 = vmatpush1.msra.mxu1 %v192_v47  ;;  %v150_v7 = vld [vmem:[%s1668_s3 + $0x38] sm:$0xff]  ;;  %v167_v10 = vld [vmem:[%s1668_s3 + $0xc0] sm:$0xff]  ;;  %v361_v13 = vld [vmem:[%s1668_s3 + $0x6d0] sm:$0xff] }
  0x1a   :  { %489 = vmatprep.subr.mxu0 %v223_v42  ;;  %422 = vmatprep.subr.mxu1 %v186_v49  ;;  %v143_v11 = vld [vmem:[%s1668_s3] sm:$0xff]  ;;  %v166_v12 = vld [vmem:[%s1668_s3 + $0xb8] sm:$0xff]  ;;  %v160_v14 = vld [vmem:[%s1668_s3 + $0x88] sm:$0xff] }
  0x1b   :  { %490 = vmatpush1.msra.mxu0 %v222_v44  ;;  %423 = vmatpush1.msra.mxu1 %v185_v51  ;;  %v360_v15 = vld [vmem:[%s1668_s3 + $0x6c8] sm:$0xff]  ;;  %v159_v16 = vld [vmem:[%s1668_s3 + $0x80] sm:$0xff]  ;;  %v354_v17 = vld [vmem:[%s1668_s3 + $0x698] sm:$0xff] }
  0x1c   :  { %491 = vmatprep.subr.mxu0 %v216_v46  ;;  %424 = vmatprep.subr.mxu1 %v179_v53  ;;  %v153_v18 = vld [vmem:[%s1668_s3 + $0x50] sm:$0xff]  ;;  %v152_v20 = vld [vmem:[%s1668_s3 + $0x48] sm:$0xff]  ;;  %v347_v21 = vld [vmem:[%s1668_s3 + $0x660] sm:$0xff] }
  0x1d   :  { %492 = vmatpush1.msra.mxu0 %v215_v48  ;;  %425 = vmatpush1.msra.mxu1 %v178_v55  ;;  %v353_v19 = vld [vmem:[%s1668_s3 + $0x690] sm:$0xff] }
  0x1e   :  { %493 = vmatprep.subr.mxu0 %v209_v50  ;;  %426 = vmatprep.subr.mxu1 %v172_v57 }
  0x1f   :  { %494 = vmatpush1.msra.mxu0 %v208_v52  ;;  %427 = vmatpush1.msra.mxu1 %v171_v59 }
  0x20   :  { %495 = vmatprep.subr.mxu0 %v202_v54  ;;  %428 = vmatprep.subr.mxu1 %v165_v61 }
  0x21   :  { %496 = vmatpush1.msra.mxu0 %v201_v56  ;;  %429 = vmatpush1.msra.mxu1 %v164_v63 }
  0x22   :  { %497 = vmatprep.subr.mxu0 %v195_v58  ;;  %430 = vmatprep.subr.mxu1 %v158_v1 }
  0x23   :  { %498 = vmatpush1.msra.mxu0 %v194_v60  ;;  %431 = vmatpush1.msra.mxu1 %v157_v3 }
  0x24   :  { %499 = vmatprep.subr.mxu0 %v188_v62  ;;  %432 = vmatprep.subr.mxu1 %v151_v5 }
  0x25   :  { %500 = vmatpush1.msra.mxu0 %v187_v0  ;;  %433 = vmatpush1.msra.mxu1 %v150_v7 }
  0x26   :  { %501 = vmatprep.subr.mxu0 %v181_v2  ;;  %434 = vmatprep.subr.mxu1 %v144_v9 }
  0x27   :  { %502 = vmatpush1.msra.mxu0 %v180_v4  ;;  %435 = vmatpush1.msra.mxu1 %v143_v11 }
  0x28   :  { %503 = vmatprep.subr.mxu0 %v174_v6  ;;  %436 = vmatprep.subr.mxu1 %v361_v13 }
  0x29   :  { %504 = vmatpush1.msra.mxu0 %v173_v8  ;;  %437 = vmatpush2.msra.mxu1 %v360_v15 }
  0x2a   :  { %505 = vmatprep.subr.mxu0 %v167_v10 }
  0x2b   :  { %506 = vmatpush1.msra.mxu0 %v166_v12 }
  0x2c   :  { %507 = vmatprep.subr.mxu0 %v160_v14 }
  0x2d   :  { %10 = vsyncpa [#allocation3], 0  ;;  %508 = vmatpush1.msra.mxu0 %v159_v16  ;;  %v146_v22 = vld [vmem:[%s1668_s3 + $0x18] sm:$0xff]  ;;  %438 = vmatprep.subr.mxu1 %v354_v17  ;;  %v145_v24 = vld [vmem:[%s1668_s3 + $0x10] sm:$0xff]  ;;  %vm730_vm1 = vcmask 130048   ;;  %vm738_vm2 = vcmask 125952  }
  0x2e   :  { %v346_v23 = vld [vmem:[%s1668_s3 + $0x658] sm:$0xff]  ;;  %509 = vmatprep.subr.mxu0 %v153_v18  ;;  %439 = vmatpush2.msra.mxu1 %v353_v19  ;;  %v340_v25 = vld [vmem:[%s1668_s3 + $0x628] sm:$0xff]  ;;  %v363_v26 = vld [vmem:[%s1668_s3 + $0x6e0] sm:$0xff] }
  0x2f   :  { %510 = vmatpush1.msra.mxu0 %v152_v20  ;;  %440 = vmatprep.subr.mxu1 %v347_v21  ;;  %v339_v27 = vld [vmem:[%s1668_s3 + $0x620] sm:$0xff]  ;;  %v362_v28 = vld [vmem:[%s1668_s3 + $0x6d8] sm:$0xff]  ;;  %v333_v29 = vld [vmem:[%s1668_s3 + $0x5f0] sm:$0xff]  ;;  %v41_v21 = vlaneseq }
  0x30   :  { %511 = vmatprep.subr.mxu0 %v146_v22  ;;  %441 = vmatpush2.msra.mxu1 %v346_v23  ;;  %v356_v30 = vld [vmem:[%s1668_s3 + $0x6a8] sm:$0xff]  ;;  %v355_v32 = vld [vmem:[%s1668_s3 + $0x6a0] sm:$0xff]  ;;  %v326_v33 = vld [vmem:[%s1668_s3 + $0x5b8] sm:$0xff] }
  0x31   :  { %512 = vmatpush1.msra.mxu0 %v145_v24  ;;  %442 = vmatprep.subr.mxu1 %v340_v25  ;;  %v332_v31 = vld [vmem:[%s1668_s3 + $0x5e8] sm:$0xff]  ;;  %v349_v34 = vld [vmem:[%s1668_s3 + $0x670] sm:$0xff]  ;;  %v319_v37 = vld [vmem:[%s1668_s3 + $0x580] sm:$0xff]  ;;  %v1330_v22 = vshrl.u32 %v41_v21, 7 }
  0x32   :  { %513 = vmatprep.subr.mxu0 %v363_v26  ;;  %443 = vmatpush2.msra.mxu1 %v339_v27  ;;  %v325_v35 = vld [vmem:[%s1668_s3 + $0x5b0] sm:$0xff]  ;;  %v348_v36 = vld [vmem:[%s1668_s3 + $0x668] sm:$0xff]  ;;  %v342_v38 = vld [vmem:[%s1668_s3 + $0x638] sm:$0xff] }
  0x33   :  { %514 = vmatpush2.msra.mxu0 %v362_v28  ;;  %444 = vmatprep.subr.mxu1 %v333_v29  ;;  %v318_v39 = vld [vmem:[%s1668_s3 + $0x578] sm:$0xff]  ;;  %v341_v40 = vld [vmem:[%s1668_s3 + $0x630] sm:$0xff]  ;;  %v312_v41 = vld [vmem:[%s1668_s3 + $0x548] sm:$0xff]  ;;  %v43_v23 = vsub.s32 0, %v1330_v22  ;;  %v47_v25 = vsub.s32 1, %v1330_v22 }
  0x34   :  { %515 = vmatprep.subr.mxu0 %v356_v30  ;;  %445 = vmatpush2.msra.mxu1 %v332_v31  ;;  %v335_v42 = vld [vmem:[%s1668_s3 + $0x600] sm:$0xff]  ;;  %v334_v44 = vld [vmem:[%s1668_s3 + $0x5f8] sm:$0xff]  ;;  %v305_v45 = vld [vmem:[%s1668_s3 + $0x510] sm:$0xff] }
  0x35   :  { %516 = vmatpush2.msra.mxu0 %v355_v32  ;;  %446 = vmatprep.subr.mxu1 %v326_v33  ;;  %v311_v43 = vld [vmem:[%s1668_s3 + $0x540] sm:$0xff]  ;;  %v328_v46 = vld [vmem:[%s1668_s3 + $0x5c8] sm:$0xff]  ;;  %v298_v49 = vld [vmem:[%s1668_s3 + $0x4d8] sm:$0xff] }
  0x36   :  { %517 = vmatprep.subr.mxu0 %v349_v34  ;;  %447 = vmatpush2.msra.mxu1 %v325_v35  ;;  %v304_v47 = vld [vmem:[%s1668_s3 + $0x508] sm:$0xff]  ;;  %v327_v48 = vld [vmem:[%s1668_s3 + $0x5c0] sm:$0xff]  ;;  %v321_v50 = vld [vmem:[%s1668_s3 + $0x590] sm:$0xff] }
  0x37   :  { %518 = vmatpush2.msra.mxu0 %v348_v36  ;;  %448 = vmatprep.subr.mxu1 %v319_v37  ;;  %v297_v51 = vld [vmem:[%s1668_s3 + $0x4d0] sm:$0xff]  ;;  %v320_v52 = vld [vmem:[%s1668_s3 + $0x588] sm:$0xff]  ;;  %v291_v53 = vld [vmem:[%s1668_s3 + $0x4a0] sm:$0xff] }
  0x38   :  { %519 = vmatprep.subr.mxu0 %v342_v38  ;;  %449 = vmatpush2.msra.mxu1 %v318_v39  ;;  %v314_v54 = vld [vmem:[%s1668_s3 + $0x558] sm:$0xff]  ;;  %v313_v56 = vld [vmem:[%s1668_s3 + $0x550] sm:$0xff]  ;;  %v284_v57 = vld [vmem:[%s1668_s3 + $0x468] sm:$0xff] }
  0x39   :  { %520 = vmatpush2.msra.mxu0 %v341_v40  ;;  %450 = vmatprep.subr.mxu1 %v312_v41  ;;  %v290_v55 = vld [vmem:[%s1668_s3 + $0x498] sm:$0xff]  ;;  %v307_v58 = vld [vmem:[%s1668_s3 + $0x520] sm:$0xff]  ;;  %v300_v60 = vld [vmem:[%s1668_s3 + $0x4e8] sm:$0xff] }
  0x3a   :  { %521 = vmatprep.subr.mxu0 %v335_v42  ;;  %451 = vmatpush2.msra.mxu1 %v311_v43  ;;  %v306_v59 = vld [vmem:[%s1668_s3 + $0x518] sm:$0xff]  ;;  %v299_v61 = vld [vmem:[%s1668_s3 + $0x4e0] sm:$0xff]  ;;  %v293_v62 = vld [vmem:[%s1668_s3 + $0x4b0] sm:$0xff] }
  0x3b   :  { %522 = vmatpush2.msra.mxu0 %v334_v44  ;;  %452 = vmatprep.subr.mxu1 %v305_v45  ;;  %v292_v63 = vld [vmem:[%s1668_s3 + $0x4a8] sm:$0xff]  ;;  %v286_v0 = vld [vmem:[%s1668_s3 + $0x478] sm:$0xff]  ;;  %v283_v1 = vld [vmem:[%s1668_s3 + $0x460] sm:$0xff] }
  0x3c   :  { %523 = vmatprep.subr.mxu0 %v328_v46  ;;  %453 = vmatpush2.msra.mxu1 %v304_v47  ;;  %v285_v2 = vld [vmem:[%s1668_s3 + $0x470] sm:$0xff]  ;;  %v279_v4 = vld [vmem:[%s1668_s3 + $0x440] sm:$0xff]  ;;  %v276_v5 = vld [vmem:[%s1668_s3 + $0x428] sm:$0xff] }
  0x3d   :  { %524 = vmatpush2.msra.mxu0 %v327_v48  ;;  %454 = vmatprep.subr.mxu1 %v298_v49  ;;  %v277_v3 = vld [vmem:[%s1668_s3 + $0x430] sm:$0xff]  ;;  %v278_v6 = vld [vmem:[%s1668_s3 + $0x438] sm:$0xff]  ;;  %v272_v8 = vld [vmem:[%s1668_s3 + $0x408] sm:$0xff] }
  0x3e   :  { %525 = vmatprep.subr.mxu0 %v321_v50  ;;  %455 = vmatpush2.msra.mxu1 %v297_v51  ;;  %v270_v7 = vld [vmem:[%s1668_s3 + $0x3f8] sm:$0xff]  ;;  %v269_v9 = vld [vmem:[%s1668_s3 + $0x3f0] sm:$0xff]  ;;  %v271_v10 = vld [vmem:[%s1668_s3 + $0x400] sm:$0xff] }
  0x3f   :  { %526 = vmatpush2.msra.mxu0 %v320_v52  ;;  %456 = vmatprep.subr.mxu1 %v291_v53  ;;  %v263_v11 = vld [vmem:[%s1668_s3 + $0x3c0] sm:$0xff]  ;;  %v265_v12 = vld [vmem:[%s1668_s3 + $0x3d0] sm:$0xff]  ;;  %v262_v13 = vld [vmem:[%s1668_s3 + $0x3b8] sm:$0xff] }
  0x40   :  { %527 = vmatprep.subr.mxu0 %v314_v54  ;;  %457 = vmatpush2.msra.mxu1 %v290_v55  ;;  %v264_v14 = vld [vmem:[%s1668_s3 + $0x3c8] sm:$0xff]  ;;  %v258_v16 = vld [vmem:[%s1668_s3 + $0x398] sm:$0xff]  ;;  %v255_v17 = vld [vmem:[%s1668_s3 + $0x380] sm:$0xff] }
  0x41   :  { %528 = vmatpush2.msra.mxu0 %v313_v56  ;;  %458 = vmatprep.subr.mxu1 %v284_v57  ;;  %v256_v15 = vld [vmem:[%s1668_s3 + $0x388] sm:$0xff]  ;;  %v257_v18 = vld [vmem:[%s1668_s3 + $0x390] sm:$0xff]  ;;  %v366_v20 = vld [vmem:[%s1668_s3 + $0x6f8] sm:$0xff] }
  0x42   :  { %529 = vmatprep.subr.mxu0 %v307_v58  ;;  %459 = vmatpush2.msra.mxu1 %v283_v1  ;;  %v253_v19 = vld [vmem:[%s1668_s3 + $0x370] sm:$0xff]  ;;  %v39_v24 = vld [vmem:[%s1667_s2] sm:$0x3]  ;;  %v252_v41 = vld [vmem:[%s1668_s3 + $0x368] sm:$0xff] }
  0x43   :  { %530 = vmatpush2.msra.mxu0 %v306_v59  ;;  %460 = vmatprep.subr.mxu1 %v277_v3  ;;  %v44_v26 = vrot.slane %v39_v24, %v43_v23  ;;  %v48_v27 = vrot.slane %v39_v24, %v47_v25  ;;  %v254_v42 = vld [vmem:[%s1668_s3 + $0x378] sm:$0xff]  ;;  %v359_v45 = vld [vmem:[%s1668_s3 + $0x6c0] sm:$0xff]  ;;  %v245_v46 = vld [vmem:[%s1668_s3 + $0x330] sm:$0xff] }
  0x44   :  { %531 = vmatprep.subr.mxu0 %v300_v60  ;;  %461 = vmatpush2.msra.mxu1 %v276_v5  ;;  %v246_v44 = vld [vmem:[%s1668_s3 + $0x338] sm:$0xff]  ;;  %v247_v47 = vld [vmem:[%s1668_s3 + $0x340] sm:$0xff]  ;;  %v352_v51 = vld [vmem:[%s1668_s3 + $0x688] sm:$0xff] }
  0x45   :  { %532 = vmatpush2.msra.mxu0 %v299_v61  ;;  %462 = vmatprep.subr.mxu1 %v270_v7  ;;  %v239_v50 = vld [vmem:[%s1668_s3 + $0x300] sm:$0xff]  ;;  %v238_v52 = vld [vmem:[%s1668_s3 + $0x2f8] sm:$0xff]  ;;  %v240_v53 = vld [vmem:[%s1668_s3 + $0x308] sm:$0xff] }
  0x46   :  { %533 = vmatprep.subr.mxu0 %v293_v62  ;;  %463 = vmatpush2.msra.mxu1 %v269_v9  ;;  %v232_v54 = vld [vmem:[%s1668_s3 + $0x2c8] sm:$0xff]  ;;  %v345_v55 = vld [vmem:[%s1668_s3 + $0x650] sm:$0xff]  ;;  %v231_v56 = vld [vmem:[%s1668_s3 + $0x2c0] sm:$0xff] }
  0x47   :  { %534 = vmatpush2.msra.mxu0 %v292_v63  ;;  %464 = vmatprep.subr.mxu1 %v263_v11  ;;  %v233_v57 = vld [vmem:[%s1668_s3 + $0x2d0] sm:$0xff]  ;;  %v338_v59 = vld [vmem:[%s1668_s3 + $0x618] sm:$0xff]  ;;  %v224_v60 = vld [vmem:[%s1668_s3 + $0x288] sm:$0xff] }
  0x48   :  { %535 = vmatprep.subr.mxu0 %v286_v0  ;;  %465 = vmatpush2.msra.mxu1 %v262_v13  ;;  %v225_v58 = vld [vmem:[%s1668_s3 + $0x290] sm:$0xff]  ;;  %v226_v61 = vld [vmem:[%s1668_s3 + $0x298] sm:$0xff]  ;;  %v331_v63 = vld [vmem:[%s1668_s3 + $0x5e0] sm:$0xff] }
  0x49   :  { %536 = vmatpush2.msra.mxu0 %v285_v2  ;;  %466 = vmatprep.subr.mxu1 %v256_v15  ;;  %v218_v62 = vld [vmem:[%s1668_s3 + $0x258] sm:$0xff]  ;;  %v217_v0 = vld [vmem:[%s1668_s3 + $0x250] sm:$0xff]  ;;  %v219_v1 = vld [vmem:[%s1668_s3 + $0x260] sm:$0xff] }
  0x4a   :  { %537 = vmatprep.subr.mxu0 %v279_v4  ;;  %467 = vmatpush2.msra.mxu1 %v255_v17  ;;  %v211_v2 = vld [vmem:[%s1668_s3 + $0x220] sm:$0xff]  ;;  %v324_v3 = vld [vmem:[%s1668_s3 + $0x5a8] sm:$0xff]  ;;  %v210_v4 = vld [vmem:[%s1668_s3 + $0x218] sm:$0xff] }
  0x4b   :  { %538 = vmatpush2.msra.mxu0 %v278_v6  ;;  %558 = vmatprep.subr.mxu1 %v253_v19  ;;  %v212_v5 = vld [vmem:[%s1668_s3 + $0x228] sm:$0xff]  ;;  %v317_v7 = vld [vmem:[%s1668_s3 + $0x570] sm:$0xff]  ;;  %v310_v11 = vld [vmem:[%s1668_s3 + $0x538] sm:$0xff] }
  0x4c   :  { %539 = vmatprep.subr.mxu0 %v272_v8  ;;  %v204_v6 = vld [vmem:[%s1668_s3 + $0x1e8] sm:$0xff]  ;;  %v203_v8 = vld [vmem:[%s1668_s3 + $0x1e0] sm:$0xff]  ;;  %v205_v9 = vld [vmem:[%s1668_s3 + $0x1f0] sm:$0xff] }
  0x4d   :  { %540 = vmatpush2.msra.mxu0 %v271_v10  ;;  %v197_v10 = vld [vmem:[%s1668_s3 + $0x1b0] sm:$0xff]  ;;  %v198_v13 = vld [vmem:[%s1668_s3 + $0x1b8] sm:$0xff]  ;;  %v303_v15 = vld [vmem:[%s1668_s3 + $0x500] sm:$0xff] }
  0x4e   :  { %541 = vmatprep.subr.mxu0 %v265_v12  ;;  %v196_v12 = vld [vmem:[%s1668_s3 + $0x1a8] sm:$0xff]  ;;  %v191_v17 = vld [vmem:[%s1668_s3 + $0x180] sm:$0xff] }
  0x4f   :  { %542 = vmatpush2.msra.mxu0 %v264_v14  ;;  %v190_v14 = vld [vmem:[%s1668_s3 + $0x178] sm:$0xff]  ;;  %v296_v19 = vld [vmem:[%s1668_s3 + $0x4c8] sm:$0xff] }
  0x50   :  { %543 = vmatprep.subr.mxu0 %v258_v16  ;;  %v189_v16 = vld [vmem:[%s1668_s3 + $0x170] sm:$0xff]  ;;  %v184_v21 = vld [vmem:[%s1668_s3 + $0x148] sm:$0xff] }
  0x51   :  { %544 = vmatpush2.msra.mxu0 %v257_v18  ;;  %v183_v18 = vld [vmem:[%s1668_s3 + $0x140] sm:$0xff]  ;;  %v176_v24 = vld [vmem:[%s1668_s3 + $0x108] sm:$0xff] }
  0x52   :  { %758 = vmatprep.subr.mxu0 %v366_v20  ;;  %v182_v20 = vld [vmem:[%s1668_s3 + $0x138] sm:$0xff] }
  0xd2   :  { %v124_v28 = vpop.f32.mrf.mxu0 }
  0xd3   :  { %v125_v29 = vadd.f32 %v124_v28, %v44_v26  ;;  %v177_v28 = vld [vmem:[%s1668_s3 + $0x110] sm:$0xff] }
  0xd4   :  { %v126_v30 = vpop.f32.mrf.mxu0 }
  0xd5   :  { %v127_v31 = vadd.f32 %v126_v30, %v48_v27  ;;  %v135_v32 = vmul.f32 0.1, %v125_v29  ;;  %v282_v30 = vld [vmem:[%s1668_s3 + $0x458] sm:$0xff] }
  0xd6   :  { %v130_v33 = vpop.f32.mrf.mxu0 }
  0xd7   :  { %v136_v34 = vmul.f32 0.1, %v127_v31  ;;  %v131_v35 = vadd.f32 %v130_v33, %v44_v26  ;;  %v1341_v39 = vmax.f32 %v125_v29, %v135_v32  ;;  %v289_v26 = vld [vmem:[%s1668_s3 + $0x490] sm:$0xff]  ;;  %v170_v32 = vld [vmem:[%s1668_s3 + $0xd8] sm:$0xff] }
  0xd8   :  { %v132_v36 = vpop.f32.mrf.mxu0  ;;  %v169_v29 = vld [vmem:[%s1668_s3 + $0xd0] sm:$0xff]  ;;  %v162_v33 = vld [vmem:[%s1668_s3 + $0x98] sm:$0xff] }
  0xd9   :  { %v140_v37 = vmax.f32 %v127_v31, %v136_v34  ;;  %v133_v38 = vadd.f32 %v132_v36, %v48_v27  ;;  %v137_v40 = vmul.f32 0.1, %v131_v35  ;;  %v175_v27 = vld [vmem:[%s1668_s3 + $0x100] sm:$0xff]  ;;  %v168_v31 = vld [vmem:[%s1668_s3 + $0xc8] sm:$0xff] }
  0xda   :  { %v275_v34 = vld [vmem:[%s1668_s3 + $0x420] sm:$0xff] }
  0xdb   :  { %v138_v43 = vmul.f32 0.1, %v133_v38  ;;  %468 = vmatprep.mubr.f32.mxu1 %v140_v37  ;;  %545 = vmatprep.mubr.f32.mxu0 %v140_v37  ;;  %v1365_v49 = vmax.f32 %v131_v35, %v137_v40  ;;  %v161_v35 = vld [vmem:[%s1668_s3 + $0x90] sm:$0xff]  ;;  %v163_v36 = vld [vmem:[%s1668_s3 + $0xa0] sm:$0xff]  ;;  %v154_v40 = vld [vmem:[%s1668_s3 + $0x58] sm:$0xff] }
  0xdc   :  { %469 = vmatmul.mubr.f32.vlgmr.msra.gmra.mxu1 %v1341_v39  ;;  %546 = vmatmul.mubr.f32.vlgmr.msra.gmra.mxu0 %v1341_v39 }
  0xdd   :  { %v1363_v48 = vmax.f32 %v133_v38, %v138_v43  ;;  %559 = vmatpush1.msra.mxu1 %v252_v41  ;;  %759 = vmatpush3.msra.mxu0 %v254_v42  ;;  %v268_v38 = vld [vmem:[%s1668_s3 + $0x3e8] sm:$0xff]  ;;  %v261_v43 = vld [vmem:[%s1668_s3 + $0x3b0] sm:$0xff] }
  0xde   :  { %560 = vmatprep.subr.mxu1 %v246_v44  ;;  %760 = vmatprep.subr.mxu0 %v359_v45  ;;  %v156_v41 = vld [vmem:[%s1668_s3 + $0x68] sm:$0xff]  ;;  %v147_v44 = vld [vmem:[%s1668_s3 + $0x20] sm:$0xff]  ;;  %v149_v45 = vld [vmem:[%s1668_s3 + $0x30] sm:$0xff] }
  0xdf   :  { %561 = vmatpush1.msra.mxu1 %v245_v46  ;;  %761 = vmatpush3.msra.mxu0 %v247_v47  ;;  %v148_v42 = vld [vmem:[%s1668_s3 + $0x28] sm:$0xff]  ;;  %v365_v46 = vld [vmem:[%s1668_s3 + $0x6f0] sm:$0xff] }
  0xe0   :  { %474 = vmatprep.mubr.f32.mxu1 %v1363_v48  ;;  %551 = vmatprep.mubr.f32.mxu0 %v1363_v48  ;;  %v364_v47 = vld [vmem:[%s1668_s3 + $0x6e8] sm:$0xff] }
  0xe1   :  { %562 = vmatprep.subr.mxu1 %v239_v50  ;;  %762 = vmatprep.subr.mxu0 %v352_v51  ;;  %v358_v50 = vld [vmem:[%s1668_s3 + $0x6b8] sm:$0xff]  ;;  %v357_v51 = vld [vmem:[%s1668_s3 + $0x6b0] sm:$0xff] }
  0xe2   :  { %475 = vmatmul.mubr.f32.gmra.mxu1 %v1365_v49  ;;  %552 = vmatmul.mubr.f32.gmra.mxu0 %v1365_v49 }
  0xe3   :  { %563 = vmatpush1.msra.mxu1 %v238_v52  ;;  %763 = vmatpush3.msra.mxu0 %v240_v53  ;;  %v351_v52 = vld [vmem:[%s1668_s3 + $0x680] sm:$0xff]  ;;  %v350_v53 = vld [vmem:[%s1668_s3 + $0x678] sm:$0xff] }
  0xe4   :  { %564 = vmatprep.subr.mxu1 %v232_v54  ;;  %622 = vmatprep.mubr.f32.mxu1 %v140_v37  ;;  %v344_v54 = vld [vmem:[%s1668_s3 + $0x648] sm:$0xff] }
  0xe5   :  { %764 = vmatprep.subr.mxu0 %v345_v55  ;;  %699 = vmatprep.mubr.f32.mxu0 %v140_v37  ;;  %v155_v37 = vld [vmem:[%s1668_s3 + $0x60] sm:$0xff] }
  0xe6   :  { %565 = vmatpush1.msra.mxu1 %v231_v56  ;;  %765 = vmatpush3.msra.mxu0 %v233_v57  ;;  %v343_v55 = vld [vmem:[%s1668_s3 + $0x640] sm:$0xff]  ;;  %v337_v56 = vld [vmem:[%s1668_s3 + $0x610] sm:$0xff]  ;;  %v336_v57 = vld [vmem:[%s1668_s3 + $0x608] sm:$0xff] }
  0xe7   :  { %566 = vmatprep.subr.mxu1 %v225_v58  ;;  %766 = vmatprep.subr.mxu0 %v338_v59  ;;  %v330_v58 = vld [vmem:[%s1668_s3 + $0x5d8] sm:$0xff]  ;;  %v329_v59 = vld [vmem:[%s1668_s3 + $0x5d0] sm:$0xff] }
  0xe8   :  { %567 = vmatpush1.msra.mxu1 %v224_v60  ;;  %767 = vmatpush3.msra.mxu0 %v226_v61  ;;  %v323_v60 = vld [vmem:[%s1668_s3 + $0x5a0] sm:$0xff]  ;;  %v322_v61 = vld [vmem:[%s1668_s3 + $0x598] sm:$0xff] }
  0xe9   :  { %568 = vmatprep.subr.mxu1 %v218_v62  ;;  %768 = vmatprep.subr.mxu0 %v331_v63  ;;  %v316_v62 = vld [vmem:[%s1668_s3 + $0x568] sm:$0xff]  ;;  %v315_v63 = vld [vmem:[%s1668_s3 + $0x560] sm:$0xff] }
  0xea   :  { %569 = vmatpush1.msra.mxu1 %v217_v0  ;;  %769 = vmatpush3.msra.mxu0 %v219_v1  ;;  %v309_v0 = vld [vmem:[%s1668_s3 + $0x530] sm:$0xff]  ;;  %v308_v1 = vld [vmem:[%s1668_s3 + $0x528] sm:$0xff] }
  0xeb   :  { %570 = vmatprep.subr.mxu1 %v211_v2  ;;  %770 = vmatprep.subr.mxu0 %v324_v3  ;;  %v302_v2 = vld [vmem:[%s1668_s3 + $0x4f8] sm:$0xff]  ;;  %v301_v3 = vld [vmem:[%s1668_s3 + $0x4f0] sm:$0xff] }
  0xec   :  { %571 = vmatpush1.msra.mxu1 %v210_v4  ;;  %771 = vmatpush3.msra.mxu0 %v212_v5  ;;  %v295_v4 = vld [vmem:[%s1668_s3 + $0x4c0] sm:$0xff]  ;;  %v294_v5 = vld [vmem:[%s1668_s3 + $0x4b8] sm:$0xff] }
  0xed   :  { %572 = vmatprep.subr.mxu1 %v204_v6  ;;  %772 = vmatprep.subr.mxu0 %v317_v7  ;;  %v288_v6 = vld [vmem:[%s1668_s3 + $0x488] sm:$0xff]  ;;  %v287_v7 = vld [vmem:[%s1668_s3 + $0x480] sm:$0xff] }
  0xee   :  { %573 = vmatpush1.msra.mxu1 %v203_v8  ;;  %773 = vmatpush3.msra.mxu0 %v205_v9  ;;  %v281_v8 = vld [vmem:[%s1668_s3 + $0x450] sm:$0xff]  ;;  %v280_v9 = vld [vmem:[%s1668_s3 + $0x448] sm:$0xff] }
  0xef   :  { %574 = vmatprep.subr.mxu1 %v197_v10  ;;  %774 = vmatprep.subr.mxu0 %v310_v11  ;;  %v274_v10 = vld [vmem:[%s1668_s3 + $0x418] sm:$0xff]  ;;  %v273_v11 = vld [vmem:[%s1668_s3 + $0x410] sm:$0xff] }
  0xf0   :  { %575 = vmatpush1.msra.mxu1 %v196_v12  ;;  %775 = vmatpush3.msra.mxu0 %v198_v13  ;;  %v267_v12 = vld [vmem:[%s1668_s3 + $0x3e0] sm:$0xff]  ;;  %v266_v13 = vld [vmem:[%s1668_s3 + $0x3d8] sm:$0xff] }
  0xf1   :  { %576 = vmatprep.subr.mxu1 %v190_v14  ;;  %776 = vmatprep.subr.mxu0 %v303_v15  ;;  %v260_v14 = vld [vmem:[%s1668_s3 + $0x3a8] sm:$0xff]  ;;  %v259_v15 = vld [vmem:[%s1668_s3 + $0x3a0] sm:$0xff]  ;;  %s851_s3 = smov [#allocation2]  }
  0xf2   :  { %577 = vmatpush1.msra.mxu1 %v189_v16  ;;  %777 = vmatpush3.msra.mxu0 %v191_v17  ;;  %v379_v16 = vsub.s32 2, %v1330_v22  ;;  %v1645_v17 = vld [vmem:[%s1669_s4] sm:$0x7f]  ;;  %s745_s4 = sshll.u32 %s851_s3, 4  ;;  %s746_s4 = int_to_ptr.vmem [resolvable:$true] %s745_s4 }
  0xf3   :  { %578 = vmatprep.subr.mxu1 %v183_v18  ;;  %778 = vmatprep.subr.mxu0 %v296_v19  ;;  %v383_v18 = vsub.s32 3, %v1330_v22  ;;  %v372_v19 = vrot.slane %v1645_v17, %v43_v23  ;;  %s828_s0 = scalar_lea.vmem %s746_s4, 1792  ;;  %p833_p1 = scmp.lt.s32.totalorder %s746_s4, %s746_s4 }
  0xf4   :  { %579 = vmatpush1.msra.mxu1 %v182_v20  ;;  %779 = vmatpush3.msra.mxu0 %v184_v21  ;;  %v380_v20 = vrot.slane %v1645_v17, %v379_v16  ;;  %p829_p0 = scmp.ne.s32.totalorder %s746_s4, %s828_s0  ;;  %p834_p2 = scmp.lt.s32.totalorder %s828_s0, %s828_s0 }
  0xf5   :  { %580 = vmatprep.subr.mxu1 %v176_v24  ;;  %780 = vmatprep.subr.mxu0 %v289_v26 }
  0xf6   :  { %581 = vmatpush1.msra.mxu1 %v175_v27  ;;  %781 = vmatpush3.msra.mxu0 %v177_v28  ;;  %p835_p3 = por %p834_p2, %p833_p1 }
  0xf7   :  { %582 = vmatprep.subr.mxu1 %v169_v29  ;;  %782 = vmatprep.subr.mxu0 %v282_v30 }
  0xf8   :  { %583 = vmatpush1.msra.mxu1 %v168_v31  ;;  %783 = vmatpush3.msra.mxu0 %v170_v32  ;;  %p836_p4 = pnand %p835_p3, %p829_p0 }
  0xf9   :  { %584 = vmatprep.subr.mxu1 %v162_v33  ;;  %784 = vmatprep.subr.mxu0 %v275_v34 }
  0xfa   :  { %585 = vmatpush1.msra.mxu1 %v161_v35  ;;  %785 = vmatpush3.msra.mxu0 %v163_v36 }
  0xfb   :  { %586 = vmatprep.subr.mxu1 %v155_v37  ;;  %786 = vmatprep.subr.mxu0 %v268_v38 }
  0xfc   :  { %587 = vmatpush1.msra.mxu1 %v154_v40  ;;  %787 = vmatpush3.msra.mxu0 %v156_v41 }
  0xfd   :  { %588 = vmatprep.subr.mxu1 %v148_v42  ;;  %788 = vmatprep.subr.mxu0 %v261_v43 }
  0xfe   :  { %589 = vmatpush1.msra.mxu1 %v147_v44  ;;  %789 = vmatpush3.msra.mxu0 %v149_v45 }
  0xff   :  { %590 = vmatprep.subr.mxu1 %v365_v46  ;;  %700 = vmatmul.mubr.f32.vlgmr.msra.gmra.mxu0 %v1341_v39  ;;  %v395_v46 = vsub.s32 6, %v1330_v22 }
 0x100   :  { %591 = vmatpush2.msra.mxu1 %v364_v47  ;;  %704 = vmatprep.mubr.f32.mxu0 %v1363_v48 }
 0x101   :  { %592 = vmatprep.subr.mxu1 %v358_v50  ;;  %v396_v50 = vrot.slane %v1645_v17, %v395_v46 }
 0x102   :  { %593 = vmatpush2.msra.mxu1 %v357_v51 }
 0x103   :  { %594 = vmatprep.subr.mxu1 %v351_v52  ;;  %705 = vmatmul.mubr.f32.gmra.mxu0 %v1365_v49 }
 0x104   :  { %595 = vmatpush2.msra.mxu1 %v350_v53 }
 0x105   :  { %596 = vmatprep.subr.mxu1 %v344_v54 }
 0x106   :  { %597 = vmatpush2.msra.mxu1 %v343_v55 }
 0x107   :  { %598 = vmatprep.subr.mxu1 %v337_v56 }
 0x108   :  { %599 = vmatpush2.msra.mxu1 %v336_v57 }
 0x109   :  { %600 = vmatprep.subr.mxu1 %v330_v58 }
 0x10a   :  { %601 = vmatpush2.msra.mxu1 %v329_v59 }
 0x10b   :  { %602 = vmatprep.subr.mxu1 %v323_v60  ;;  %v387_v60 = vsub.s32 4, %v1330_v22 }
 0x10c   :  { %603 = vmatpush2.msra.mxu1 %v322_v61  ;;  %v391_v61 = vsub.s32 5, %v1330_v22 }
 0x10d   :  { %604 = vmatprep.subr.mxu1 %v316_v62  ;;  %v388_v62 = vrot.slane %v1645_v17, %v387_v60 }
 0x10e   :  { %605 = vmatpush2.msra.mxu1 %v315_v63  ;;  %v392_v63 = vrot.slane %v1645_v17, %v391_v61 }
 0x10f   :  { %606 = vmatprep.subr.mxu1 %v309_v0 }
 0x110   :  { %607 = vmatpush2.msra.mxu1 %v308_v1 }
 0x111   :  { %608 = vmatprep.subr.mxu1 %v302_v2 }
 0x112   :  { %609 = vmatpush2.msra.mxu1 %v301_v3 }
 0x113   :  { %610 = vmatprep.subr.mxu1 %v295_v4 }
 0x114   :  { %611 = vmatpush2.msra.mxu1 %v294_v5 }
 0x115   :  { %612 = vmatprep.subr.mxu1 %v288_v6 }
 0x116   :  { %613 = vmatpush2.msra.mxu1 %v287_v7 }
 0x117   :  { %614 = vmatprep.subr.mxu1 %v281_v8 }
 0x118   :  { %615 = vmatpush2.msra.mxu1 %v280_v9 }
 0x119   :  { %616 = vmatprep.subr.mxu1 %v274_v10 }
 0x11a   :  { %617 = vmatpush2.msra.mxu1 %v273_v11 }
 0x11b   :  { %618 = vmatprep.subr.mxu1 %v267_v12 }
 0x11c   :  { %619 = vmatpush2.msra.mxu1 %v266_v13 }
 0x11d   :  { %620 = vmatprep.subr.mxu1 %v260_v14 }
 0x11e   :  { %621 = vmatpush2.msra.mxu1 %v259_v15 }
 0x11f   :  { %623 = vmatmul.mubr.f32.vlgmr.msra.gmra.mxu1 %v1341_v39  ;;  %v376_v39 = vrot.slane %v1645_v17, %v47_v25 }
 0x120   :  { %628 = vmatprep.mubr.f32.mxu1 %v1363_v48  ;;  %v384_v48 = vrot.slane %v1645_v17, %v383_v18 }
 0x123   :  { %629 = vmatmul.mubr.f32.gmra.mxu1 %v1365_v49 }
 0x19c   :  { %v470_v49 = vpop.f32.mrf.mxu1  ;;  %v547_v21 = vpop.f32.mrf.mxu0 }
 0x19d   :  { %v471_v24 = vadd.f32 %v470_v49, %v372_v19  ;;  %v548_v26 = vadd.f32 %v547_v21, %v380_v20 }
 0x19e   :  { %v472_v27 = vpop.f32.mrf.mxu1  ;;  %v549_v28 = vpop.f32.mrf.mxu0 }
 0x19f   :  { %800 = vtanh.f32 %v471_v24  ;;  %v473_v29 = vadd.f32 %v472_v27, %v376_v39  ;;  %v550_v30 = vadd.f32 %v549_v28, %v384_v48 }
 0x1a0   :  { %802 = vtanh.f32 %v548_v26 }
 0x1a1   :  { %804 = vtanh.f32 %v473_v29 }
 0x1a2   :  { %806 = vtanh.f32 %v550_v30  ;;  %v553_v23 = vpop.f32.mrf.mxu0  ;;  %v476_v31 = vpop.f32.mrf.mxu1 }
 0x1a3   :  { %v554_v32 = vadd.f32 %v553_v23, %v380_v20  ;;  %v477_v33 = vadd.f32 %v476_v31, %v372_v19 }
 0x1a4   :  { %v555_v34 = vpop.f32.mrf.mxu0  ;;  %v478_v25 = vpop.f32.mrf.mxu1 }
 0x1a5   :  { %808 = vtanh.f32 %v554_v32  ;;  %v556_v35 = vadd.f32 %v555_v34, %v384_v48  ;;  %v479_v36 = vadd.f32 %v478_v25, %v376_v39 }
 0x1a6   :  { %810 = vtanh.f32 %v477_v33 }
 0x1a7   :  { %812 = vtanh.f32 %v556_v35 }
 0x1a8   :  { %814 = vtanh.f32 %v479_v36 }
 0x1ac   :  { %v801_v37 = vpop.eup %800 }
 0x1ad   :  { %v803_v38 = vpop.eup %802  ;;  %724 = vst [vmem:[#allocation2] sm:$0xff] %v801_v37 }
 0x1ae   :  { %v805_v40 = vpop.eup %804  ;;  %726 = vst [vmem:[#allocation2 + $0x10] sm:$0xff] %v803_v38 }
 0x1af   :  { %v807_v41 = vpop.eup %806  ;;  %725 = vst [vmem:[#allocation2 + $0x8] sm:$0xff] %v805_v40 }
 0x1b0   :  { %727 = vst [vmem:[#allocation2 + $0x18] sm:$0xff] %v807_v41 }
 0x1b2   :  { %v809_v42 = vpop.eup %808 }
 0x1b3   :  { %v811_v43 = vpop.eup %810  ;;  %734 = vst [vmem:[#allocation2 + $0x48] sm:$0xf] %v809_v42 }
 0x1b4   :  { %v813_v44 = vpop.eup %812  ;;  %732 = vst [vmem:[#allocation2 + $0x38] sm:$0xf] %v811_v43 }
 0x1b5   :  { %v815_v45 = vpop.eup %814  ;;  %735 = vst [vmem:[#allocation2 + $0x50] sm:$0xf] %v813_v44 }
 0x1b6   :  { %733 = vst [vmem:[#allocation2 + $0x40] sm:$0xf] %v815_v45 }
 0x1bf   :  { %v790_v47 = vpop.f32.mrf.mxu0 }
 0x1c1   :  { %v791_v51 = vpop.f32.mrf.mxu0 }
 0x1c2   :  { %v792_v52 = vadd.f32 %v791_v51, %v790_v47 }
 0x1c3   :  { %v793_v53 = vpop.f32.mrf.mxu0 }
 0x1c4   :  { %v702_v54 = vadd.f32 %v792_v52, %v396_v50 }
 0x1c5   :  { %v794_v55 = vpop.f32.mrf.mxu0 }
 0x1c6   :  { %816 = vtanh.f32 %v702_v54  ;;  %v795_v56 = vadd.f32 %v794_v55, %v793_v53 }
 0x1c8   :  { %v707_v57 = vadd.f32 %v795_v56, %v396_v50 }
 0x1ca   :  { %818 = vtanh.f32 %v707_v57 }
 0x1d3   :  { %v817_v58 = vpop.eup %816 }
 0x1d4   :  { %731 = vst.msk [vmem:[#allocation2 + $0x30] sm:$0xff] %vm730_vm1, %v817_v58 }
 0x1d7   :  { %v819_v59 = vpop.eup %818 }
 0x1d8   :  { %739 = vst.msk [vmem:[#allocation2 + $0x68] sm:$0xf] %vm738_vm2, %v819_v59 }
 0x1df   :  { %v624_v0 = vpop.f32.mrf.mxu1 }
 0x1e0   :  { %v625_v1 = vadd.f32 %v624_v0, %v388_v62 }
 0x1e1   :  { %v626_v2 = vpop.f32.mrf.mxu1 }
 0x1e2   :  { %820 = vtanh.f32 %v625_v1  ;;  %v627_v3 = vadd.f32 %v626_v2, %v392_v63 }
 0x1e3   :  { %v630_v4 = vpop.f32.mrf.mxu1 }
 0x1e4   :  { %822 = vtanh.f32 %v627_v3  ;;  %v631_v5 = vadd.f32 %v630_v4, %v388_v62 }
 0x1e5   :  { %v632_v6 = vpop.f32.mrf.mxu1 }
 0x1e6   :  { %824 = vtanh.f32 %v631_v5  ;;  %v633_v7 = vadd.f32 %v632_v6, %v392_v63 }
 0x1e8   :  { %826 = vtanh.f32 %v633_v7 }
 0x1ef   :  { %v821_v8 = vpop.eup %820 }
 0x1f0   :  { %728 = vst [vmem:[#allocation2 + $0x20] sm:$0xff] %v821_v8 }
 0x1f1   :  { %v823_v22 = vpop.eup %822 }
 0x1f2   :  { %729 = vst [vmem:[#allocation2 + $0x28] sm:$0xff] %v823_v22 }
 0x1f3   :  { %v825_v9 = vpop.eup %824 }
 0x1f4   :  { %736 = vst [vmem:[#allocation2 + $0x58] sm:$0xf] %v825_v9 }
 0x1f5   :  { %v827_v10 = vpop.eup %826 }
 0x1f6   :  { %737 = vst [vmem:[#allocation2 + $0x60] sm:$0xf] %v827_v10 }
 0x1f7   :  { %839 = shalt.err (!%p836_p4)
}
 0x1f8   :  { %s852_s18 = smov 896   ;;  %s853_s19 = smov 56  }
 0x1f9   :  { %751 = dma.vmem_to_hbm [thread:$0]  %s746_s4, 1792, %s1670_s5, [#allocation3], %s852_s18, %s852_s18, %s853_s19  }
 0x1fa   :  { %848 = dma.done.wait [#allocation3], 1792  }
 0x1fb   :  { %849 = vsyncadd [#allocation3], 4294965504 }
 0x1fc   :  { %755 = vsyncpa [#allocation3], 1 }

</bundles_post_ra>
